<compile_context>
chip_gen: v7x
topology: tpu7x:2x2x1
jax: 0.10.0
libtpu: 0.0.40
codegen_flags: <defaults>
</compile_context>

<pallas_src>
import functools

import jax
import jax.numpy as jnp
from jax.experimental import pallas as pl
from jax.experimental.pallas import tpu as pltpu

_LANES = 128


def _round_up(x, m):
    return ((x + m - 1) // m) * m


def _sublane_multiple(itemsize):
    # f32 -> 8, bf16 -> 16, int8/fp8 -> 32 (rows packed per sublane group).
    return 8 * max(1, 4 // int(itemsize))


def _padded_vmem_bytes(tb, feat, itemsize, buffers):
    """Physical VMEM footprint of one pipeline stage (all buffers).

    Accounts for (8,128)-tile padding: z blocks pad lanes to multiples of 128
    and sublanes to the packed-dtype multiple; the (tb,1) f32 label block pads
    its lane dim to 128 (~512*tb bytes/buffer); the (1,128) output pads to a
    full (8,128) tile per buffer.
    """
    sub = _sublane_multiple(itemsize)
    z_block = _round_up(tb, sub) * _round_up(feat, _LANES) * itemsize
    label_block = _round_up(tb, 8) * _LANES * 4
    out_block = 8 * _LANES * 4
    return buffers * (2 * z_block + label_block) + 2 * out_block


def _pick_block_rows(batch, feat, itemsize, vmem_budget, buffers=2):
    """Largest sublane-aligned TB whose padded, multi-buffered footprint fits."""
    sub = _sublane_multiple(itemsize)
    if _padded_vmem_bytes(batch, feat, itemsize, buffers) <= vmem_budget:
        return batch                      # whole array in one block
    per_row = buffers * (2 * _round_up(feat, _LANES) * itemsize + _LANES * 4)
    tb = (vmem_budget - 2 * 8 * _LANES * 4) // max(per_row, 1)
    tb = max(sub, (tb // sub) * sub)
    return min(tb, batch)


def _contrastive_kernel(z1_ref, z2_ref, label_ref, out_ref, *,
                        margin, rows_in_last_tile, mask_last_tile):
    # Load in native dtype; upcast on the VPU (keeps HBM traffic at input width).
    z1 = z1_ref[...].astype(jnp.float32)                       # (TB, D)
    z2 = z2_ref[...].astype(jnp.float32)                       # (TB, D)
    label = label_ref[...].astype(jnp.float32)                 # (TB, 1)

    diff = z1 - z2                                             # VPU
    sq_dist = jnp.sum(diff * diff, axis=1, keepdims=True)      # (TB, 1) XLU reduce
    dist = jnp.sqrt(sq_dist)                                   # EUP
    hinge = jnp.maximum(margin - dist, 0.0)
    per_sample = (1.0 - label) * sq_dist + label * hinge * hinge   # (TB, 1)

    def write(total):
        # Lane-dense (1, 128) output block: unmasked vst, distinct block per
        # grid step so the batch axis can be "parallel" (v7x megacore).
        out_ref[...] = jnp.broadcast_to(total, (1, _LANES))

    if not mask_last_tile:
        # B divides evenly into tiles: no masking anywhere.
        write(jnp.sum(per_sample))
    else:
        is_last = pl.program_id(0) == pl.num_programs(0) - 1

        @pl.when(jnp.logical_not(is_last))
        def _():
            write(jnp.sum(per_sample))

        @pl.when(is_last)
        def _():
            # Padded rows of the partial last tile hold undefined data; mask
            # with a select so NaN/Inf can never propagate into the sum.
            row = jax.lax.broadcasted_iota(jnp.int32, per_sample.shape, 0)
            valid = row < rows_in_last_tile
            write(jnp.sum(jnp.where(valid, per_sample, 0.0)))


def contrastive_loss(z1, z2, label, margin, *, block_rows=None,
                     use_pallas=None, buffer_count=2):
    """z1, z2: (B, D) float32/bfloat16; label: (B,) of {0, 1}. Returns scalar f32."""
    B, D = z1.shape
    itemsize = jnp.dtype(z1.dtype).itemsize

    if use_pallas is None:
        # Below a few MiB the pallas_call launch + per-step overhead dominates;
        # let XLA's fused reduce handle it.
        use_pallas = B * D * itemsize >= (2 << 20)
    if not use_pallas:
        z1f, z2f = z1.astype(jnp.float32), z2.astype(jnp.float32)
        lab = label.astype(jnp.float32)
        sq = jnp.sum((z1f - z2f) ** 2, axis=1)
        hinge = jnp.maximum(margin - jnp.sqrt(sq), 0.0)
        return jnp.mean((1.0 - lab) * sq + lab * hinge * hinge)

    label2d = label.reshape(B, 1).astype(jnp.float32)

    # Generation-aware VMEM budget (v7x: 64 MiB physical -> ~48 MiB budget;
    # v5e/v6e: 128 MiB physical -> ~96 MiB budget).
    try:
        vmem_capacity = int(pltpu.get_tpu_info().vmem_capacity_bytes)
    except Exception:  # pragma: no cover - conservative fallback
        vmem_capacity = 64 << 20
    vmem_budget = min(int(0.75 * vmem_capacity), 96 << 20)

    sub = _sublane_multiple(itemsize)
    buffers = max(2, int(buffer_count))
    if block_rows is None:
        tb = _pick_block_rows(B, D, itemsize, vmem_budget, buffers)
    else:
        tb = min(int(block_rows), B)
        if tb < B:
            tb = max(sub, (tb // sub) * sub)    # sublane-aligned tile
    num_tiles = pl.cdiv(B, tb)

    vmem_needed = _padded_vmem_bytes(tb, D, itemsize, buffers)
    vmem_limit = int(min(vmem_capacity, max(vmem_needed + (4 << 20), 32 << 20)))

    # NOTE: margin / B are compile-time constants (recompile per new value);
    # pass margin via scalar-prefetch if it varies at runtime.
    mask_last_tile = (B % tb) != 0
    rows_in_last_tile = B - (num_tiles - 1) * tb
    kernel = functools.partial(
        _contrastive_kernel,
        margin=float(margin),
        rows_in_last_tile=int(rows_in_last_tile),
        mask_last_tile=bool(mask_last_tile),
    )

    # Optionally deepen input buffering (sweep 2 vs 3 if DMA is exposed).
    if buffers != 2:
        pm = pl.Buffered(buffers)
        z_spec = pl.BlockSpec((tb, D), lambda i: (i, 0), pipeline_mode=pm)
    else:
        z_spec = pl.BlockSpec((tb, D), lambda i: (i, 0))

    partials = pl.pallas_call(
        kernel,
        out_shape=jax.ShapeDtypeStruct((1, num_tiles * _LANES), jnp.float32),
        grid_spec=pltpu.PrefetchScalarGridSpec(
            num_scalar_prefetch=0,
            grid=(num_tiles,),
            in_specs=[
                z_spec,                                      # z1
                z_spec,                                      # z2
                pl.BlockSpec((tb, 1), lambda i: (i, 0)),     # label
            ],
            out_specs=pl.BlockSpec((1, _LANES), lambda i: (0, i)),
        ),
        compiler_params=pltpu.CompilerParams(
            dimension_semantics=("parallel",),
            vmem_limit_bytes=vmem_limit,
        ),
    )(z1, z2, label2d)

    # Every lane of each (1,128) partial block holds the same tile sum:
    # a dense reduction over all lanes, divided by 128*B, gives the mean.
    return jnp.sum(partials) / jnp.float32(_LANES * B)


if __name__ == "__main__":
    B, D = 200, 64          # deliberately not a multiple of the tile to exercise masking
    margin = 1.0

    key = jax.random.PRNGKey(0)
    k1, k2, k3 = jax.random.split(key, 3)
    z1 = jax.random.normal(k1, (B, D), dtype=jnp.float32)
    z2 = jax.random.normal(k2, (B, D), dtype=jnp.float32)
    label = jax.random.bernoulli(k3, p=0.5, shape=(B,)).astype(jnp.float32)

    # Force the Pallas path (auto-dispatch would hand this tiny shape to XLA).
    loss = contrastive_loss(z1, z2, label, margin, block_rows=64, use_pallas=True)
    loss = jax.block_until_ready(loss)

    # pure-JAX reference check
    dist = jnp.linalg.norm(z1 - z2, axis=1)
    ref = jnp.mean(
        (1.0 - label) * dist ** 2
        + label * jnp.maximum(margin - dist, 0.0) ** 2
    )
    assert jnp.allclose(loss, ref, rtol=1e-5, atol=1e-4), (loss, ref)

    print("KERNEL_OK")
</pallas_src>

<mosaic_0001>
module attributes {stable_mosaic.version = 11 : i64} {
  func.func @_contrastive_kernel(%arg0: i32, %arg1: memref<64x64xf32, #tpu.memory_space<vmem>>, %arg2: memref<64x64xf32, #tpu.memory_space<vmem>>, %arg3: memref<64x1xf32, #tpu.memory_space<vmem>>, %arg4: memref<1x128xf32, #tpu.memory_space<vmem>>) attributes {dimension_semantics = [#tpu.dimension_semantics<parallel>], iteration_bounds = array<i64: 4>, scalar_prefetch = 0 : i64, scratch_operands = 0 : i64, tpu.core_type = #tpu.core_type<tc>, window_params = [{transform_indices = @transform_0, window_bounds = array<i64: 64, 64>}, {transform_indices = @transform_1, window_bounds = array<i64: 64, 64>}, {transform_indices = @transform_2, window_bounds = array<i64: 64, 1>}, {transform_indices = @transform_3, window_bounds = array<i64: 1, 128>}]} {
    %c0 = arith.constant 0 : index
    %c0_0 = arith.constant 0 : index
    %0 = vector.load %arg1[%c0, %c0_0] : memref<64x64xf32, #tpu.memory_space<vmem>>, vector<64x64xf32>
    %c0_1 = arith.constant 0 : index
    %c0_2 = arith.constant 0 : index
    %1 = vector.load %arg2[%c0_1, %c0_2] : memref<64x64xf32, #tpu.memory_space<vmem>>, vector<64x64xf32>
    %c0_3 = arith.constant 0 : index
    %c0_4 = arith.constant 0 : index
    %2 = vector.load %arg3[%c0_3, %c0_4] : memref<64x1xf32, #tpu.memory_space<vmem>>, vector<64x1xf32>
    %3 = arith.subf %0, %1 : vector<64x64xf32>
    %4 = arith.mulf %3, %3 : vector<64x64xf32>
    %cst = arith.constant dense<0.000000e+00> : vector<64xf32>
    %5 = vector.multi_reduction <add>, %4, %cst [1] : vector<64x64xf32> to vector<64xf32>
    %6 = vector.shape_cast %5 : vector<64xf32> to vector<64x1xf32>
    %7 = math.sqrt %6 : vector<64x1xf32>
    %cst_5 = arith.constant 1.000000e+00 : f32
    %8 = vector.broadcast %cst_5 : f32 to vector<64x1xf32>
    %9 = arith.subf %8, %7 : vector<64x1xf32>
    %cst_6 = arith.constant 0.000000e+00 : f32
    %10 = vector.broadcast %cst_6 : f32 to vector<64x1xf32>
    %11 = arith.maximumf %9, %10 : vector<64x1xf32>
    %cst_7 = arith.constant 1.000000e+00 : f32
    %12 = vector.broadcast %cst_7 : f32 to vector<64x1xf32>
    %13 = arith.subf %12, %2 : vector<64x1xf32>
    %14 = arith.mulf %13, %6 : vector<64x1xf32>
    %15 = arith.mulf %2, %11 : vector<64x1xf32>
    %16 = arith.mulf %15, %11 : vector<64x1xf32>
    %17 = arith.addf %14, %16 : vector<64x1xf32>
    %c3_i32 = arith.constant 3 : i32
    %18 = arith.cmpi eq, %arg0, %c3_i32 : i32
    %true = arith.constant true
    %19 = arith.xori %18, %true : i1
    %20 = arith.extui %19 : i1 to i32
    %c0_i32 = arith.constant 0 : i32
    %21 = arith.cmpi ne, %20, %c0_i32 : i32
    scf.if %21 {
      %24 = vector.shape_cast %17 : vector<64x1xf32> to vector<1x64x1xf32>
      %cst_9 = arith.constant dense<0.000000e+00> : vector<1xf32>
      %25 = vector.multi_reduction <add>, %24, %cst_9 [1, 2] : vector<1x64x1xf32> to vector<1xf32>
      %26 = vector.shape_cast %25 : vector<1xf32> to vector<1x1x1xf32>
      %27 = vector.extract %26[0, 0, 0] : f32 from vector<1x1x1xf32>
      %28 = vector.broadcast %27 : f32 to vector<1x128xf32>
      %c0_10 = arith.constant 0 : index
      %c0_11 = arith.constant 0 : index
      %29 = vector.load %arg4[%c0_10, %c0_11] : memref<1x128xf32, #tpu.memory_space<vmem>>, vector<1x128xf32>
      tpu.vector_store %arg4[%c0_10, %c0_11], %28 {strides = array<i32>} : memref<1x128xf32, #tpu.memory_space<vmem>>, vector<1x128xf32>,
    } else {
    }
    %22 = arith.extui %18 : i1 to i32
    %c0_i32_8 = arith.constant 0 : i32
    %23 = arith.cmpi ne, %22, %c0_i32_8 : i32
    scf.if %23 {
      %24 = tpu.iota {dimensions = array<i32: 0>} : vector<64x1xi32>
      %c8_i32 = arith.constant 8 : i32
      %25 = vector.broadcast %c8_i32 : i32 to vector<64x1xi32>
      %26 = arith.cmpi slt, %24, %25 : vector<64x1xi32>
      %cst_9 = arith.constant 0.000000e+00 : f32
      %27 = vector.broadcast %cst_9 : f32 to vector<64x1xf32>
      %28 = arith.select %26, %17, %27 : vector<64x1xi1>, vector<64x1xf32>
      %29 = vector.shape_cast %28 : vector<64x1xf32> to vector<1x64x1xf32>
      %cst_10 = arith.constant dense<0.000000e+00> : vector<1xf32>
      %30 = vector.multi_reduction <add>, %29, %cst_10 [1, 2] : vector<1x64x1xf32> to vector<1xf32>
      %31 = vector.shape_cast %30 : vector<1xf32> to vector<1x1x1xf32>
      %32 = vector.extract %31[0, 0, 0] : f32 from vector<1x1x1xf32>
      %33 = vector.broadcast %32 : f32 to vector<1x128xf32>
      %c0_11 = arith.constant 0 : index
      %c0_12 = arith.constant 0 : index
      %34 = vector.load %arg4[%c0_11, %c0_12] : memref<1x128xf32, #tpu.memory_space<vmem>>, vector<1x128xf32>
      tpu.vector_store %arg4[%c0_11, %c0_12], %33 {strides = array<i32>} : memref<1x128xf32, #tpu.memory_space<vmem>>, vector<1x128xf32>,
    } else {
    }
    return
  }
  func.func @transform_0(%arg0: i32) -> (i32, i32) {
    %c0_i32 = arith.constant 0 : i32
    %c0_i32_0 = arith.constant 0 : i32
    return %arg0, %c0_i32 : i32, i32
  }
  func.func @transform_1(%arg0: i32) -> (i32, i32) {
    %c0_i32 = arith.constant 0 : i32
    %c0_i32_0 = arith.constant 0 : i32
    return %arg0, %c0_i32 : i32, i32
  }
  func.func @transform_2(%arg0: i32) -> (i32, i32) {
    %c0_i32 = arith.constant 0 : i32
    %c0_i32_0 = arith.constant 0 : i32
    return %arg0, %c0_i32 : i32, i32
  }
  func.func @transform_3(%arg0: i32) -> (i32, i32) {
    %c0_i32 = arith.constant 0 : i32
    %c0_i32_0 = arith.constant 0 : i32
    return %c0_i32, %arg0 : i32, i32
  }
}

</mosaic_0001>

<bundles_post_ra>
// kernel: tpu_custom_call.1
= control target key start
LH: loop header
LB: loop body
LE: loop exit
PB: predicated region body
PF: predicated region fallthrough
CT: control target
= control target key end

     0   :  { %8 = vsyncpa [#allocation3], 0  ;;  %s1049_s0 = inlined_call_operand.vmem [shape: f32[200,64], index: 0, kind: input, shape index: {}]   ;;  %s1050_s1 = inlined_call_operand.vmem [shape: f32[200,64], index: 1, kind: input, shape index: {}]   ;;  %s1051_s2 = inlined_call_operand.vmem [shape: f32[200,1], index: 2, kind: input, shape index: {}]   ;;  %s1052_s3 = inlined_call_operand.hbm [shape: f32[1,512], index: 3, kind: output, shape index: {}]  }
   0x1   :  { %10 = vsyncpa [#allocation3 + $0x1], 0  ;;  %s789_s12 = smov 0   ;;  %s791_s13 = smov 0  }
   0x2   :  { %s793_s14 = smov 0   ;;  %s795_s15 = smov 0  }
   0x3 LB: > { %s810_s16 = sadd.s32 4294967295, %s766_s15   ;;  %s630_s17 = sadd.s32 4294967294, %s766_s15   ;;  %s766_s15 = sphi %s795_s15, %s1058_s15   ;;  %s762_s14 = sphi %s793_s14, %s1057_s14   ;;  %s758_s13 = sphi %s791_s13, %s1056_s13   ;;  %s754_s12 = sphi %s789_s12, %s1055_s12  }
   0x4   : > { %s814_s18 = sadd.s32 1, %s766_s15   ;;  %s101_s19 = sadd.s32 1, %s762_s14 }
   0x5   : > { %s98_s20 = ssub.s32 %s766_s15, %s814_s18  ;;  %p111_p0 = scmp.ne.s32.totalorder %s762_s14, %s758_s13 }
   0x6   : > { %p99_p1 = scmp.eq.s32.totalorder %s98_s20, 0  ;;  %p112_p2 = scmp.eq.s32.totalorder %s810_s16, 3 }
   0x7   : > { %p117_p3 = scmp.ne.s32.totalorder %s758_s13, %s754_s12  ;;  %p118_p4 = scmp.eq.s32.totalorder %s630_s17, 3 }
   0x8   : > { %s825_s21 = scalar_select %p99_p1, %s762_s14, %s101_s19  }
   0x9   : > { %p829_p5 = por %p112_p2, %p111_p0  ;;  %p833_p6 = por %p118_p4, %p117_p3 }
   0xa   : > { %p633_p7 = scmp.ge.s32.totalorder %s766_s15, 1  ;;  %p187_p8 = scmp.lt.s32.totalorder %s766_s15, 5 }
   0xc   : > { %p188_p9 = pnand %p633_p7, %p187_p8 }
   0xd   : > { %s634_s24 = sshll.u32 (!%p188_p9), %s810_s16, 3  ;;  %vm314_vm0 = vcmask (!%p188_p9), 523264   ;;  %s230_s5 = sand.u32 (!%p188_p9), 1, %s758_s13  }
   0xe   : > { %191 = sbr.rel (%p188_p9) target bundleno = 658 (0x292), region = 32  ;;  %p237_p10 = scmp.lt.s32.totalorder (!%p188_p9), %s634_s24, 24 }
   0xf   : > { %s997_s9 = scalar_lea.vmem (!%p188_p9), [#allocation2], %s230_s5 }
  0x15   : > { %s1060_s24 = smov (!%p237_p10, %s634_s24), 24 }
  0x16   : > { %s840_s25 = sshll.u32 %s1060_s24, 3 }
  0x17   : > { %s240_s28 = scalar_lea.vmem %s1049_s0, %s840_s25  ;;  %s254_s4 = scalar_lea.vmem %s1050_s1, %s840_s25 }
  0x18   : > { %v276_v0 = vld [vmem:[%s240_s28 + $0x10] sm:$0xff]  ;;  %v274_v2 = vld [vmem:[%s240_s28] sm:$0xff]  ;;  %v277_v5 = vld [vmem:[%s240_s28 + $0x18] sm:$0xff]  ;;  %s863_s8 = scalar_lea.vmem %s1051_s2, %s840_s25 }
  0x19   : > { %v284_v1 = vld [vmem:[%s254_s4 + $0x10] sm:$0xff]  ;;  %v282_v4 = vld [vmem:[%s254_s4] sm:$0xff]  ;;  %v285_v6 = vld [vmem:[%s254_s4 + $0x18] sm:$0xff] }
  0x1a   : > { %v300_v3 = vsub.f32 %v276_v0, %v284_v1  ;;  %v298_v7 = vsub.f32 %v274_v2, %v282_v4  ;;  %v301_v8 = vsub.f32 %v277_v5, %v285_v6  ;;  %v275_v9 = vld [vmem:[%s240_s28 + $0x8] sm:$0xff]  ;;  %v278_v15 = vld [vmem:[%s240_s28 + $0x20] sm:$0xff]  ;;  %v281_v21 = vld [vmem:[%s240_s28 + $0x38] sm:$0xff] }
  0x1b   : > { %v283_v10 = vld [vmem:[%s254_s4 + $0x8] sm:$0xff]  ;;  %v286_v16 = vld [vmem:[%s254_s4 + $0x20] sm:$0xff]  ;;  %v289_v22 = vld [vmem:[%s254_s4 + $0x38] sm:$0xff] }
  0x1c   : > { %v279_v11 = vld [vmem:[%s240_s28 + $0x28] sm:$0xff]  ;;  %v308_v12 = vmul.f32 %v300_v3, %v300_v3  ;;  %v299_v13 = vsub.f32 %v275_v9, %v283_v10  ;;  %v306_v17 = vmul.f32 %v298_v7, %v298_v7  ;;  %v309_v18 = vmul.f32 %v301_v8, %v301_v8  ;;  %v280_v25 = vld [vmem:[%s240_s28 + $0x30] sm:$0xff]  ;;  %v869_v43 = vld [vmem:[%s863_s8] sm:$0xff] }
  0x1d   : > { %v287_v14 = vld [vmem:[%s254_s4 + $0x28] sm:$0xff]  ;;  %v302_v20 = vsub.f32 %v278_v15, %v286_v16  ;;  %v288_v26 = vld [vmem:[%s254_s4 + $0x30] sm:$0xff]  ;;  %v305_v30 = vsub.f32 %v281_v21, %v289_v22  ;;  %v874_v45 = vld [vmem:[%s863_s8 + $0x18] sm:$0xff]  ;;  %v411_v51 = vsub.f32 1.0, %v869_v43 }
  0x1e   : > { %v303_v19 = vsub.f32 %v279_v11, %v287_v14  ;;  %v321_v23 = vsel %vm314_vm0, %v308_v12, 0.0  ;;  %v307_v24 = vmul.f32 %v299_v13, %v299_v13  ;;  %v315_v27 = vsel %vm314_vm0, %v306_v17, 0.0  ;;  %v866_v42 = vld [vmem:[%s863_s8 + $0x10] sm:$0xff]  ;;  %v878_v46 = vld [vmem:[%s863_s8 + $0x8] sm:$0xff]  ;;  %v888_v50 = vld [vmem:[%s863_s8 + $0x20] sm:$0xff] }
  0x1f   : > { %322 = vadd.xlane.f32.xlu1 %v321_v23  ;;  %316 = vadd.xlane.f32.xlu0 %v315_v27  ;;  %v324_v28 = vsel %vm314_vm0, %v309_v18, 0.0  ;;  %v310_v32 = vmul.f32 %v302_v20, %v302_v20  ;;  %v304_v33 = vsub.f32 %v280_v25, %v288_v26  ;;  %v313_v35 = vmul.f32 %v305_v30, %v305_v30  ;;  %v883_v48 = vld [vmem:[%s863_s8 + $0x28] sm:$0xff] }
  0x20   : > { %v311_v29 = vmul.f32 %v303_v19, %v303_v19  ;;  %v318_v31 = vsel %vm314_vm0, %v307_v24, 0.0  ;;  %v413_v49 = vsub.f32 1.0, %v866_v42  ;;  %v414_v52 = vsub.f32 1.0, %v874_v45 }
  0x21   : > { %v327_v36 = vsel %vm314_vm0, %v310_v32, 0.0  ;;  %v312_v37 = vmul.f32 %v304_v33, %v304_v33  ;;  %v336_v38 = vsel %vm314_vm0, %v313_v35, 0.0  ;;  %v412_v53 = vsub.f32 1.0, %v878_v46 }
  0x22   : > { %v330_v34 = vsel %vm314_vm0, %v311_v29, 0.0  ;;  %v416_v54 = vsub.f32 1.0, %v883_v48  ;;  %v415_v56 = vsub.f32 1.0, %v888_v50 }
  0x23   : > { %325 = vadd.xlane.f32.xlu1 %v324_v28  ;;  %319 = vadd.xlane.f32.xlu0 %v318_v31  ;;  %v333_v39 = vsel %vm314_vm0, %v312_v37, 0.0 }
  0x27   : > { %331 = vadd.xlane.f32.xlu1 %v330_v34  ;;  %328 = vadd.xlane.f32.xlu0 %v327_v36 }
  0x2b   : > { %337 = vadd.xlane.f32.xlu1 %v336_v38  ;;  %334 = vadd.xlane.f32.xlu0 %v333_v39 }
  0xac   : > { %v323_v40 = vpop.xlane.xlu1 %322  ;;  %v317_v41 = vpop.xlane.xlu0 %316 }
  0xad   : > { %688 = vrsqrt.f32 %v323_v40  ;;  %vm355_vm1 = vcmp.eq.f32.partialorder %v323_v40, inf  ;;  %vm357_vm2 = vcmp.eq.f32.partialorder %v323_v40, 0.0  ;;  %v358_v58 = vand.u32 2147483648, %v323_v40 }
  0xae   : > { %690 = vrsqrt.f32 %v317_v41  ;;  %v900_v59 = vmul.f32 %v413_v49, %v323_v40  ;;  %vm341_vm3 = vcmp.eq.f32.partialorder %v317_v41, inf  ;;  %vm343_vm4 = vcmp.eq.f32.partialorder %v317_v41, 0.0 }
  0xaf   : > { %v344_v61 = vand.u32 2147483648, %v317_v41  ;;  %v903_v62 = vmul.f32 %v411_v51, %v317_v41 }
  0xb0   : > { %v871_v44 = vpop.xlane.xlu1 %325  ;;  %v880_v47 = vpop.xlane.xlu0 %319 }
  0xb1   : > { %692 = vrsqrt.f32 %v871_v44  ;;  %vm362_vm5 = vcmp.eq.f32.partialorder %v871_v44, inf  ;;  %vm364_vm6 = vcmp.eq.f32.partialorder %v871_v44, 0.0  ;;  %v365_v1 = vand.u32 2147483648, %v871_v44 }
  0xb2   : > { %694 = vrsqrt.f32 %v880_v47  ;;  %v909_v2 = vmul.f32 %v414_v52, %v871_v44  ;;  %vm348_vm7 = vcmp.eq.f32.partialorder %v880_v47, inf  ;;  %vm350_vm8 = vcmp.eq.f32.partialorder %v880_v47, 0.0 }
  0xb3   : > { %v351_v7 = vand.u32 2147483648, %v880_v47  ;;  %v921_v8 = vmul.f32 %v412_v53, %v880_v47 }
  0xb4   : > { %v894_v55 = vpop.xlane.xlu1 %331  ;;  %v898_v57 = vpop.xlane.xlu0 %328 }
  0xb5   : > { %696 = vrsqrt.f32 %v894_v55  ;;  %vm376_vm9 = vcmp.eq.f32.partialorder %v894_v55, inf  ;;  %vm378_vm10 = vcmp.eq.f32.partialorder %v894_v55, 0.0  ;;  %v379_v16 = vand.u32 2147483648, %v894_v55 }
  0xb6   : > { %698 = vrsqrt.f32 %v898_v57  ;;  %vm369_vm11 = vcmp.eq.f32.partialorder %v898_v57, inf  ;;  %vm371_vm12 = vcmp.eq.f32.partialorder %v898_v57, 0.0  ;;  %v372_v21 = vand.u32 2147483648, %v898_v57 }
  0xb7   : > { %v689_v60 = vpop.eup %688 }
  0xb8   : > { %v691_v63 = vpop.eup %690  ;;  %v354_v0 = vmul.f32 %v689_v60, %v323_v40  ;;  %v911_v3 = vpop.xlane.xlu1 %337 }
  0xb9   : > { %v340_v4 = vmul.f32 %v691_v63, %v317_v41  ;;  %700 = vrsqrt.f32 %v911_v3  ;;  %v916_v5 = vpop.xlane.xlu0 %334  ;;  %vm390_vm13 = vcmp.eq.f32.partialorder %v911_v3, inf  ;;  %vm392_vm14 = vcmp.eq.f32.partialorder %v911_v3, 0.0 }
  0xba   : > { %v356_v6 = vsel %vm355_vm1, %v323_v40, %v354_v0  ;;  %702 = vrsqrt.f32 %v916_v5  ;;  %v393_v34 = vand.u32 2147483648, %v911_v3  ;;  %vm383_vm15 = vcmp.eq.f32.partialorder %v916_v5, inf }
  0xbb   : > { %v693_v9 = vpop.eup %692  ;;  %v359_v10 = vsel %vm357_vm2, %v358_v58, %v356_v6  ;;  %v342_v11 = vsel %vm341_vm3, %v317_v41, %v340_v4  ;;  %vm385_vm0 = vcmp.eq.f32.partialorder %v916_v5, 0.0  ;;  %v297_v6 = vld [vmem:[%s863_s8 + $0x38] sm:$0xff]  ;;  %vm456_vm1 = vcmask (!%p112_p2), 7168  }
  0xbc   : > { %v695_v12 = vpop.eup %694  ;;  %v397_v13 = vsub.f32 1.0, %v359_v10  ;;  %v345_v14 = vsel %vm343_vm4, %v344_v61, %v342_v11  ;;  %v361_v15 = vmul.f32 %v693_v9, %v871_v44 }
  0xbd   : > { %v395_v17 = vsub.f32 1.0, %v345_v14  ;;  %v347_v18 = vmul.f32 %v695_v12, %v880_v47 }
  0xbe   : > { %v405_v19 = vmax.f32 %v397_v13, 0.0  ;;  %v363_v20 = vsel %vm362_vm5, %v871_v44, %v361_v15  ;;  %v296_v13 = vld [vmem:[%s863_s8 + $0x30] sm:$0xff] }
  0xbf   : > { %v697_v22 = vpop.eup %696  ;;  %v403_v23 = vmax.f32 %v395_v17, 0.0  ;;  %v366_v24 = vsel %vm364_vm6, %v365_v1, %v363_v20  ;;  %v349_v25 = vsel %vm348_vm7, %v880_v47, %v347_v18  ;;  %v423_v17 = vmul.f32 %v415_v56, %v898_v57 }
  0xc0   : > { %v699_v26 = vpop.eup %698  ;;  %v429_v27 = vmul.f32 %v405_v19, %v866_v42  ;;  %v398_v28 = vsub.f32 1.0, %v366_v24  ;;  %v352_v29 = vsel %vm350_vm8, %v351_v7, %v349_v25  ;;  %v375_v30 = vmul.f32 %v697_v22, %v894_v55 }
  0xc1   : > { %v427_v31 = vmul.f32 %v403_v23, %v869_v43  ;;  %v396_v32 = vsub.f32 1.0, %v352_v29  ;;  %v368_v33 = vmul.f32 %v699_v26, %v898_v57 }
  0xc2   : > { %v437_v35 = vmul.f32 %v429_v27, %v405_v19  ;;  %v406_v36 = vmax.f32 %v398_v28, 0.0  ;;  %v377_v37 = vsel %vm376_vm9, %v894_v55, %v375_v30  ;;  %v418_v19 = vsub.f32 1.0, %v297_v6 }
  0xc3   : > { %v701_v38 = vpop.eup %700  ;;  %v435_v39 = vmul.f32 %v427_v31, %v403_v23  ;;  %v404_v40 = vmax.f32 %v396_v32, 0.0  ;;  %v380_v41 = vsel %vm378_vm10, %v379_v16, %v377_v37  ;;  %v370_v42 = vsel %vm369_vm11, %v898_v57, %v368_v33 }
  0xc4   : > { %v703_v43 = vpop.eup %702  ;;  %v445_v44 = vadd.f32 %v437_v35, %v900_v59  ;;  %v430_v47 = vmul.f32 %v406_v36, %v874_v45  ;;  %v400_v49 = vsub.f32 1.0, %v380_v41  ;;  %v373_v51 = vsel %vm371_vm12, %v372_v21, %v370_v42 }
  0xc5   : > { %v966_v52 = vadd.f32 %v435_v39, %v903_v62  ;;  %v428_v53 = vmul.f32 %v404_v40, %v878_v46  ;;  %v399_v58 = vsub.f32 1.0, %v373_v51  ;;  %v389_v60 = vmul.f32 %v701_v38, %v911_v3 }
  0xc6   : > { %v438_v61 = vmul.f32 %v430_v47, %v406_v36  ;;  %v408_v63 = vmax.f32 %v400_v49, 0.0  ;;  %v382_v59 = vmul.f32 %v703_v43, %v916_v5  ;;  %v386_v62 = vand.u32 2147483648, %v916_v5 }
  0xc7   : > { %v436_v45 = vmul.f32 %v428_v53, %v404_v40  ;;  %v407_v0 = vmax.f32 %v399_v58, 0.0  ;;  %v391_v1 = vsel %vm390_vm13, %v911_v3, %v389_v60  ;;  %v417_v21 = vsub.f32 1.0, %v296_v13 }
  0xc8   : > { %v446_v46 = vadd.f32 %v438_v61, %v909_v2  ;;  %v432_v4 = vmul.f32 %v408_v63, %v883_v48  ;;  %v394_v7 = vsel %vm392_vm14, %v393_v34, %v391_v1  ;;  %v384_v9 = vsel %vm383_vm15, %v916_v5, %v382_v59 }
  0xc9   : > { %v444_v10 = vadd.f32 %v436_v45, %v921_v8  ;;  %v431_v11 = vmul.f32 %v407_v0, %v888_v50  ;;  %v402_v12 = vsub.f32 1.0, %v394_v7  ;;  %v387_v14 = vsel %vm385_vm0, %v386_v62, %v384_v9 }
  0xca   : > { %v424_v2 = vmul.f32 %v416_v54, %v894_v55  ;;  %v440_v15 = vmul.f32 %v432_v4, %v408_v63  ;;  %v401_v16 = vsub.f32 1.0, %v387_v14  ;;  %v426_v26 = vmul.f32 %v418_v19, %v911_v3 }
  0xcb   : > { %v439_v18 = vmul.f32 %v431_v11, %v407_v0  ;;  %v410_v20 = vmax.f32 %v402_v12, 0.0  ;;  %v425_v54 = vmul.f32 %v417_v21, %v916_v5  ;;  %v457_v50 = vsel (!%p112_p2), %vm456_vm1, %v966_v52, 0.0 }
  0xcc   : > { %v448_v8 = vadd.f32 %v440_v15, %v424_v2  ;;  %v409_v22 = vmax.f32 %v401_v16, 0.0  ;;  %455 = sbr.rel (%p112_p2) target bundleno = 425 (0x1a9), region = 36  ;;  %v458_v56 = vsel (!%p112_p2), %vm456_vm1, %v444_v10, 0.0  ;;  %v460_v57 = vsel (!%p112_p2), %vm456_vm1, %v445_v44, 0.0 }
  0xcd   : > { %v447_v23 = vadd.f32 %v439_v18, %v423_v17  ;;  %v434_v24 = vmul.f32 %v410_v20, %v297_v6  ;;  %v459_v29 = vadd.f32 (!%p112_p2), %v458_v56, %v457_v50  ;;  %v462_v30 = vsel (!%p112_p2), %vm456_vm1, %v446_v46, 0.0 }
  0xce   : > { %v433_v25 = vmul.f32 %v409_v22, %v296_v13  ;;  %v466_v5 = vsel (!%p112_p2), %vm456_vm1, %v448_v8, 0.0 }
  0xcf   : > { %v442_v48 = vmul.f32 %v434_v24, %v410_v20  ;;  %v461_v3 = vadd.f32 (!%p112_p2), %v460_v57, %v459_v29  ;;  %v464_v31 = vsel (!%p112_p2), %vm456_vm1, %v447_v23, 0.0 }
  0xd0   : > { %v441_v55 = vmul.f32 %v433_v25, %v409_v22 }
  0xd1   : > { %v450_v27 = vadd.f32 %v442_v48, %v426_v26  ;;  %v463_v32 = vadd.f32 (!%p112_p2), %v462_v30, %v461_v3 }
  0xd2   : > { %v449_v28 = vadd.f32 %v441_v55, %v425_v54 }
  0xd3   : > { %v465_v33 = vadd.f32 %v464_v31, %v463_v32  ;;  %v470_v36 = vsel %vm456_vm1, %v450_v27, 0.0 }
  0xd4   : > { %v468_v34 = vsel %vm456_vm1, %v449_v28, 0.0 }
  0xd5   : > { %v467_v35 = vadd.f32 %v466_v5, %v465_v33 }
  0xd7   : > { %v469_v37 = vadd.f32 %v468_v34, %v467_v35 }
  0xd9   : > { %v471_v38 = vadd.f32 %v470_v36, %v469_v37 }
  0xdb   : > { %472 = vadd.xlane.f32.xlu0 %v471_v38 }
 0x168   : > { %v473_v39 = vpop.xlane.xlu0 %472 }
 0x169   : > { %v474_v40 = vrot.slane %v473_v39, 4 }
 0x16b   : > { %v475_v41 = vadd.f32 %v474_v40, %v473_v39 }
 0x16d   : > { %v476_v42 = vrot.slane %v475_v41, 2 }
 0x16f   : > { %v477_v43 = vadd.f32 %v476_v42, %v475_v41 }
 0x171   : > { %v478_v44 = vrot.slane %v477_v43, 1 }
 0x173   : > { %v479_v47 = vadd.f32 %v478_v44, %v477_v43 }
 0x175   : > { %645 = vpush %v479_v47 }
 0x1a6   : > { %s646_s10 = spop %645 }
 0x1a7   : > { %v481_v49 = vstv %s646_s10 }
 0x1a8   : > { %482 = vst [vmem:[%s997_s9] sm:$0x1] %v481_v49 }
 0x1a9 PF: > { %p641_p11 = scmp.ne.s32.totalorder %s810_s16, 3 }
 0x1aa   : > { %vm511_vm2 = vcmask (!%p641_p11), 7168  }
 0x1ab   : > { %485 = sbr.rel (%p641_p11) target bundleno = 634 (0x27a), region = 40  ;;  %v512_v51 = vsel (!%p641_p11), %vm511_vm2, %v966_v52, 0.0 }
 0x1ac   : > { %527 = vadd.xlane.f32.xlu0 (!%p641_p11), %v512_v51 }
 0x239   : > { %v528_v53 = vpop.xlane.xlu0 %527 }
 0x23a   : > { %v529_v58 = vrot.slane %v528_v53, 4 }
 0x23c   : > { %v530_v60 = vadd.f32 %v529_v58, %v528_v53 }
 0x23e   : > { %v531_v61 = vrot.slane %v530_v60, 2 }
 0x240   : > { %v532_v63 = vadd.f32 %v531_v61, %v530_v60 }
 0x242   : > { %v533_v59 = vrot.slane %v532_v63, 1 }
 0x244   : > { %v534_v45 = vadd.f32 %v533_v59, %v532_v63 }
 0x246   : > { %647 = vpush %v534_v45 }
 0x277   : > { %s648_s11 = spop %647 }
 0x278   : > { %v536_v0 = vstv %s648_s11 }
 0x279   : > { %537 = vst [vmem:[%s997_s9] sm:$0x1] %v536_v0 }
 0x27a PF: > { %s642_s17 = sshll.u32 %s810_s16, 4  ;;  %s551_s25 = sshll.u32 %s997_s9, 4  ;;  %s552_s25 = int_to_ptr.vmem [resolvable:$true] %s551_s25 }
 0x27b   : > { %s1010_s24 = scalar_lea.hbm %s1052_s3, %s642_s17  ;;  %s539_s26 = scalar_lea.sflag [#allocation3], %s230_s5 }
 0x27c   : > { %s704_s27 = scalar_lea.vmem %s552_s25, 16  ;;  %s768_s28 = smov [#allocation2]  }
 0x27d   : > { %p705_p12 = scmp.ne.s32.totalorder %s552_s25, %s704_s27  ;;  %s708_s29 = sshll.u32 %s768_s28, 4  ;;  %s709_s29 = int_to_ptr.vmem [resolvable:$false] %s708_s29 }
 0x27e   : > { %s710_s30 = scalar_lea.vmem %s709_s29, 32  ;;  %p711_p1 = scmp.lt.s32.totalorder %s552_s25, %s709_s29 }
 0x27f   : > { %p706_p13 = pnand %p705_p12, %p829_p5  ;;  %p712_p2 = scmp.lt.s32.totalorder %s710_s30, %s704_s27 }
 0x281   : > { %p707_p0 = pneg %p706_p13  ;;  %p713_p3 = por %p712_p2, %p711_p1 }
 0x283   : > { %p714_p4 = pnand %p713_p3, %p707_p0 }
 0x285   : > { %717 = shalt.err (!%p714_p4)
}
 0x286   : > { %s718_s16 = scalar_lea.hbm %s1010_s24, 16  ;;  %s722_s6 = scalar_lea.hbm %s1052_s3, 64 }
 0x287   : > { %p719_p7 = scmp.ne.s32.totalorder %s1010_s24, %s718_s16  ;;  %p723_p10 = scmp.lt.u32.totalorder %s1010_s24, %s1052_s3 }
 0x288   : > { %p724_p11 = scmp.lt.u32.totalorder %s722_s6, %s718_s16  ;;  %p726_p13 = scmp.lt.u32.totalorder %s718_s16, %s1010_s24 }
 0x289   : > { %p720_p8 = pnand %p719_p7, %p829_p5 }
 0x28a   : > { %p725_p12 = por %p724_p11, %p723_p10 }
 0x28b   : > { %p721_p9 = pneg %p720_p8 }
 0x28c   : > { %p727_p0 = por %p726_p13, %p725_p12 }
 0x28e   : > { %p728_p1 = pnand %p727_p0, %p721_p9 }
 0x290   : > { %731 = shalt.err (!%p728_p1)
}
 0x291   : > { %649 = dma.vmem_to_hbm [thread:$0]  (%p829_p5), %s552_s25, 16, %s1010_s24, %s539_s26  }
 0x292 PF: > { %p655_p2 = scmp.ge.s32.totalorder %s766_s15, 2  ;;  %s563_s9 = sand.u32 1, %s754_s12  }
 0x293   : > { %s564_s10 = scalar_lea.sflag [#allocation3], %s563_s9 }
 0x294   : > { %p652_p3 = pnand %p655_p2, %p833_p6 }
 0x296   : > { %749 = dma.done.wait (!%p652_p3), %s564_s10, 16  }
 0x297   : > { %751 = vsyncadd (!%p652_p3), %s564_s10, 4294967280  ;;  %p13_p4 = scmp.ge.s32.totalorder %s814_s18, 6   ;;  %s1055_s12 = smov %s758_s13 }
 0x298   : > { %s1056_s13 = smov %s762_s14  ;;  %s1057_s14 = smov %s825_s21 }
 0x299   : > { %s1058_s15 = smov %s814_s18  ;;  %15 = sbr.rel (!%p13_p4) target bundleno = 3 (0x3), region = 81 }
 0x2a0   :  { %568 = vsyncpa [#allocation3], 1 }
 0x2a1   :  { %570 = vsyncpa [#allocation3 + $0x1], 1 }

</bundles_post_ra>
